<compile_context>
chip_gen: v7x
topology: tpu7x:2x2x1
jax: 0.10.0
libtpu: 0.0.40
codegen_flags: <defaults>
</compile_context>

<pallas_src>
import jax
import jax.numpy as jnp
from jax import lax
from jax.experimental import pallas as pl
from jax.experimental.pallas import tpu as pltpu

# ---- synthetic "config" (small, but consistent with the module) ----
NM = 4          # config.Nm        : input channels
C_ = 8          # config.C         : height (conv2 kernel spans it fully)
T_ = 16         # config.T         : time samples (even, for the stride-2 conv)
NUM_CLASS = 3   # config.num_class
CH = 120        # hidden channels (fixed by the module)
CHP = 128       # lane-padded hidden channels
BATCH = 2

K_ = NM * C_        # folded contraction size for conv1+conv2 (32)
K2 = 2 * K_         # even/odd concatenated contraction size (64)
S_ = T_ // 2        # width after the stride-2 conv (8)
U_ = S_ - 1         # width after the (1,10)/pad-4 conv (7)
KW = 10             # last conv kernel width
PADW = 4            # last conv padding


def dnn_kernel(x_ref, wpre_ref, wpost_ref, o_ref):
    # x_ref:     (S_*NPAD, K2)     row r = s*NPAD + n; cols = [x(n,:,:,2s) | x(n,:,:,2s+1)];
    #                              rows with n >= N are zero padding (kept for vreg alignment).
    # wpre_ref:  (K2 + 1, CHP)     rows [0:K2] = folded pre-ReLU weight, row K2 = bias.
    # wpost_ref: (S_*CHP + 1, NC)  rows [0:S_*CHP] = folded post-ReLU weight, last row = bias.
    # o_ref:     (N, NC)
    npad = x_ref.shape[0] // S_
    nb = o_ref.shape[0]

    # Fused pre-ReLU matmul over all (time-step, sample) rows at once (one MXU launch).
    y = jnp.dot(x_ref[...], wpre_ref[0:K2, :], preferred_element_type=jnp.float32)
    y = jnp.maximum(y + wpre_ref[K2:K2 + 1, :], 0.0)            # (S_*NPAD, CHP)

    # Relayout (S_*NPAD, CHP) -> (NPAD, S_*CHP): lane-concat the vreg-aligned per-step blocks.
    y2 = jnp.concatenate([y[s * npad:(s + 1) * npad, :] for s in range(S_)], axis=1)

    # Fused post-ReLU matmul (conv4 + FC folded) -- one MXU launch with K = S_*CHP.
    out = jnp.dot(y2, wpost_ref[0:S_ * CHP, :], preferred_element_type=jnp.float32)
    out = out + wpost_ref[S_ * CHP:S_ * CHP + 1, :]             # (NPAD, NC)
    o_ref[...] = out[0:nb, :]                                   # drop padded rows


def fold_params(params):
    """One-time folding of all conv/FC weights into two matmuls. Call once, outside jit path."""
    w1, b1, w2, b2, w3, b3, w4, b4, fcw, fcb = params
    hp = lax.Precision.HIGHEST

    # ---- fold conv1 (1x1, Nm->1) + conv2 ((C,1), 1->CH) into one (Nm*C -> CH) map ----
    w1v = w1[0, :, 0, 0]                                            # (Nm,)
    w2m = w2[:, 0, :, 0]                                            # (CH, C)
    w12 = (w1v[:, None, None] * jnp.transpose(w2m)[None, :, :]).reshape(K_, CH)
    b12 = b2 + b1[0] * jnp.sum(w2m, axis=1)                         # (CH,)

    # ---- fold conv3 ((1,2), stride 2): two taps folded into one pre-ReLU matmul ----
    w30 = jnp.transpose(w3[:, :, 0, 0])                             # (CH_in, CH_out)
    w31 = jnp.transpose(w3[:, :, 0, 1])
    wpre = jnp.concatenate(
        [jnp.dot(w12, w30, precision=hp), jnp.dot(w12, w31, precision=hp)], axis=0)  # (K2, CH)
    bpre = jnp.dot(b12, w30 + w31, precision=hp) + b3               # (CH,)

    # ---- fold conv4 ((1,10), pad (0,4)) + Linear head into one (S_*CH -> NC) matmul ----
    w4s = jnp.transpose(w4[:, :, 0, :], (2, 1, 0))                  # (KW, CH_in, CH_out)
    fcws = jnp.transpose(fcw.reshape(NUM_CLASS, CH, U_), (2, 1, 0))  # (U_, CH_out, NC)
    # NOTE: jax.nn.one_hot maps out-of-range indices (negative or >= S_) to all-zero rows,
    # which implements conv4's zero padding exactly (documented one_hot behavior).
    shift = jnp.arange(U_)[:, None] + jnp.arange(KW)[None, :] - PADW   # (U_, KW)
    smap = jax.nn.one_hot(shift, S_, dtype=jnp.float32)
    wpost = jnp.einsum('kic,ucn,uks->sin', w4s, fcws, smap, precision=hp)  # (S_, CH, NC)
    bpost = fcb + jnp.einsum('c,ucn->n', b4, fcws, precision=hp)    # (NC,)

    # ---- lane-pad hidden channels 120 -> 128 and append biases as the last weight row ----
    wpre_b = jnp.concatenate(
        [jnp.pad(wpre, ((0, 0), (0, CHP - CH))),
         jnp.pad(bpre, (0, CHP - CH))[None, :]], axis=0)            # (K2+1, CHP)
    wpost_b = jnp.concatenate(
        [jnp.pad(wpost, ((0, 0), (0, CHP - CH), (0, 0))).reshape(S_ * CHP, NUM_CLASS),
         bpost[None, :]], axis=0)                                   # (S_*CHP+1, NC)
    return wpre_b, wpost_b


def dnn_forward(x, wpre_b, wpost_b):
    """Jitted per-call path: one relayout of x + one Pallas call (two fused matmuls)."""
    N = x.shape[0]
    assert x.shape[1:] == (NM, C_, T_)
    npad = ((N + 7) // 8) * 8    # pad samples to a multiple of 8 -> all kernel slices vreg-aligned

    # NCHW -> (S_*npad, [even-K | odd-K]); row r = s*npad + n (single fused transpose + pad).
    xin = jnp.transpose(x.reshape(N, K_, S_, 2), (2, 0, 3, 1)).reshape(S_, N, K2)
    xin = jnp.pad(xin, ((0, 0), (0, npad - N), (0, 0))).reshape(S_ * npad, K2)

    vmem = pltpu.MemorySpace.VMEM
    # Batch is tiny -> single grid-less call (one TensorCore).  If the production batch grows,
    # block the sample axis with a BlockSpec grid + dimension_semantics=("parallel",) so v7x's
    # two TensorCores split it, and size the per-block M to >=256 (>=128 on v5e).
    return pl.pallas_call(
        dnn_kernel,
        out_shape=jax.ShapeDtypeStruct((N, NUM_CLASS), jnp.float32),
        in_specs=[pl.BlockSpec(memory_space=vmem)] * 3,
        out_specs=pl.BlockSpec(memory_space=vmem),
    )(xin, wpre_b, wpost_b)


def init_params(key):
    ks = jax.random.split(key, 10)
    s = 0.1
    w1 = s * jax.random.normal(ks[0], (1, NM, 1, 1), jnp.float32)
    b1 = s * jax.random.normal(ks[1], (1,), jnp.float32)
    w2 = s * jax.random.normal(ks[2], (CH, 1, C_, 1), jnp.float32)
    b2 = s * jax.random.normal(ks[3], (CH,), jnp.float32)
    w3 = s * jax.random.normal(ks[4], (CH, CH, 1, 2), jnp.float32)
    b3 = s * jax.random.normal(ks[5], (CH,), jnp.float32)
    w4 = s * jax.random.normal(ks[6], (CH, CH, 1, KW), jnp.float32)
    b4 = s * jax.random.normal(ks[7], (CH,), jnp.float32)
    fcw = s * jax.random.normal(ks[8], (NUM_CLASS, CH * U_), jnp.float32)
    fcb = s * jax.random.normal(ks[9], (NUM_CLASS,), jnp.float32)
    return (w1, b1, w2, b2, w3, b3, w4, b4, fcw, fcb)


def reference(x, params):
    """Pure-JAX (XLA conv) reference mirroring the PyTorch forward (dropout = identity)."""
    w1, b1, w2, b2, w3, b3, w4, b4, fcw, fcb = params
    dn = ("NCHW", "OIHW", "NCHW")
    prec = lax.Precision.HIGHEST
    y = lax.conv_general_dilated(x, w1, (1, 1), "VALID", dimension_numbers=dn,
                                 precision=prec) + b1[None, :, None, None]
    y = lax.conv_general_dilated(y, w2, (1, 1), "VALID", dimension_numbers=dn,
                                 precision=prec) + b2[None, :, None, None]
    y = lax.conv_general_dilated(y, w3, (1, 2), "VALID", dimension_numbers=dn,
                                 precision=prec) + b3[None, :, None, None]
    y = jnp.maximum(y, 0.0)
    y = lax.conv_general_dilated(y, w4, (1, 1), ((0, 0), (PADW, PADW)),
                                 dimension_numbers=dn,
                                 precision=prec) + b4[None, :, None, None]
    y = y.reshape(x.shape[0], -1)
    return jnp.dot(y, fcw.T, precision=prec) + fcb


if __name__ == "__main__":
    key = jax.random.PRNGKey(0)
    pkey, xkey = jax.random.split(key)
    params = init_params(pkey)
    x = jax.random.normal(xkey, (BATCH, NM, C_, T_), jnp.float32)

    # One-time weight folding, hoisted OUT of the per-call jitted path.
    wpre_b, wpost_b = jax.block_until_ready(fold_params(params))

    forward = jax.jit(dnn_forward)
    out = jax.block_until_ready(forward(x, wpre_b, wpost_b))

    ref = reference(x, params)
    assert out.shape == (BATCH, NUM_CLASS), out.shape
    assert jnp.allclose(out, ref, atol=1e-3, rtol=1e-3), (out, ref)
    print("KERNEL_OK")
</pallas_src>

<mosaic_0001>
module attributes {stable_mosaic.version = 11 : i64} {
  func.func @dnn_kernel(%arg0: memref<64x64xf32, #tpu.memory_space<vmem>>, %arg1: memref<65x128xf32, #tpu.memory_space<vmem>>, %arg2: memref<1025x3xf32, #tpu.memory_space<vmem>>, %arg3: memref<2x3xf32, #tpu.memory_space<vmem>>) attributes {dimension_semantics = [], scalar_prefetch = 0 : i64, scratch_operands = 0 : i64, tpu.core_type = #tpu.core_type<tc>} {
    %c0 = arith.constant 0 : index
    %c0_0 = arith.constant 0 : index
    %0 = vector.load %arg0[%c0, %c0_0] : memref<64x64xf32, #tpu.memory_space<vmem>>, vector<64x64xf32>
    %c0_1 = arith.constant 0 : index
    %c0_2 = arith.constant 0 : index
    %1 = vector.load %arg1[%c0_1, %c0_2] : memref<65x128xf32, #tpu.memory_space<vmem>>, vector<64x128xf32>
    %cst = arith.constant dense<0.000000e+00> : vector<64x128xf32>
    %2 = tpu.matmul %0, %1, %cst {dimension_numbers = #tpu.dot_dimension_numbers<[1], [0], [0], [1], [0, 0, 1, 1], [], []>} : vector<64x64xf32>, vector<64x128xf32>, vector<64x128xf32> -> vector<64x128xf32>
    %c64 = arith.constant 64 : index
    %c0_3 = arith.constant 0 : index
    %3 = vector.load %arg1[%c64, %c0_3] : memref<65x128xf32, #tpu.memory_space<vmem>>, vector<1x128xf32>
    %4 = vector.broadcast %3 : vector<1x128xf32> to vector<64x128xf32>
    %5 = arith.addf %2, %4 : vector<64x128xf32>
    %cst_4 = arith.constant 0.000000e+00 : f32
    %6 = vector.broadcast %cst_4 : f32 to vector<64x128xf32>
    %7 = arith.maximumf %5, %6 : vector<64x128xf32>
    %8 = vector.extract_strided_slice %7 {offsets = [0, 0], sizes = [8, 128], strides = [1, 1]} : vector<64x128xf32> to vector<8x128xf32>
    %9 = vector.extract_strided_slice %7 {offsets = [8, 0], sizes = [8, 128], strides = [1, 1]} : vector<64x128xf32> to vector<8x128xf32>
    %10 = vector.extract_strided_slice %7 {offsets = [16, 0], sizes = [8, 128], strides = [1, 1]} : vector<64x128xf32> to vector<8x128xf32>
    %11 = vector.extract_strided_slice %7 {offsets = [24, 0], sizes = [8, 128], strides = [1, 1]} : vector<64x128xf32> to vector<8x128xf32>
    %12 = vector.extract_strided_slice %7 {offsets = [32, 0], sizes = [8, 128], strides = [1, 1]} : vector<64x128xf32> to vector<8x128xf32>
    %13 = vector.extract_strided_slice %7 {offsets = [40, 0], sizes = [8, 128], strides = [1, 1]} : vector<64x128xf32> to vector<8x128xf32>
    %14 = vector.extract_strided_slice %7 {offsets = [48, 0], sizes = [8, 128], strides = [1, 1]} : vector<64x128xf32> to vector<8x128xf32>
    %15 = vector.extract_strided_slice %7 {offsets = [56, 0], sizes = [8, 128], strides = [1, 1]} : vector<64x128xf32> to vector<8x128xf32>
    %16 = tpu.concatenate %8, %9, %10, %11, %12, %13, %14, %15 in 1 : vector<8x128xf32>, vector<8x128xf32>, vector<8x128xf32>, vector<8x128xf32>, vector<8x128xf32>, vector<8x128xf32>, vector<8x128xf32>, vector<8x128xf32> -> vector<8x1024xf32>
    %c0_5 = arith.constant 0 : index
    %c0_6 = arith.constant 0 : index
    %17 = vector.load %arg2[%c0_5, %c0_6] : memref<1025x3xf32, #tpu.memory_space<vmem>>, vector<1024x3xf32>
    %cst_7 = arith.constant dense<0.000000e+00> : vector<8x3xf32>
    %18 = tpu.matmul %16, %17, %cst_7 {dimension_numbers = #tpu.dot_dimension_numbers<[1], [0], [0], [1], [0, 0, 1, 1], [], []>} : vector<8x1024xf32>, vector<1024x3xf32>, vector<8x3xf32> -> vector<8x3xf32>
    %c1024 = arith.constant 1024 : index
    %c0_8 = arith.constant 0 : index
    %19 = vector.load %arg2[%c1024, %c0_8] : memref<1025x3xf32, #tpu.memory_space<vmem>>, vector<1x3xf32>
    %20 = vector.broadcast %19 : vector<1x3xf32> to vector<8x3xf32>
    %21 = arith.addf %18, %20 : vector<8x3xf32>
    %22 = vector.extract_strided_slice %21 {offsets = [0, 0], sizes = [2, 3], strides = [1, 1]} : vector<8x3xf32> to vector<2x3xf32>
    %c0_9 = arith.constant 0 : index
    %c0_10 = arith.constant 0 : index
    %23 = vector.load %arg3[%c0_9, %c0_10] : memref<2x3xf32, #tpu.memory_space<vmem>>, vector<2x3xf32>
    tpu.vector_store %arg3[%c0_9, %c0_10], %22 {strides = array<i32>} : memref<2x3xf32, #tpu.memory_space<vmem>>, vector<2x3xf32>,
    return
  }
}

</mosaic_0001>

<bundles_post_ra>
// kernel: dnn_forward.1
= control target key start
LH: loop header
LB: loop body
LE: loop exit
PB: predicated region body
PF: predicated region fallthrough
CT: control target
= control target key end

     0   :  { %vm36_vm0 = vcmask 523264   ;;  %s1461_s0 = inlined_call_operand.vmem [shape: f32[64,64], index: 0, kind: input, shape index: {}]   ;;  %s1462_s1 = inlined_call_operand.vmem [shape: f32[65,128], index: 1, kind: input, shape index: {}]   ;;  %s1463_s2 = inlined_call_operand.vmem [shape: f32[1025,3], index: 2, kind: input, shape index: {}]   ;;  %s1464_s3 = inlined_call_operand.hbm [shape: f32[2,3], index: 3, kind: output, shape index: {}]  }
   0x1   :  { %v23_v0 = vld [vmem:[%s1462_s1] sm:$0xff]  ;;  %v24_v1 = vld [vmem:[%s1462_s1 + $0x8] sm:$0xff]  ;;  %v25_v2 = vld [vmem:[%s1462_s1 + $0x10] sm:$0xff] }
   0x2   :  { %v797_v3 = vpack.c.bf16 %v24_v1, %v23_v0  ;;  %v26_v4 = vld [vmem:[%s1462_s1 + $0x18] sm:$0xff]  ;;  %v27_v6 = vld [vmem:[%s1462_s1 + $0x20] sm:$0xff]  ;;  %v28_v7 = vld [vmem:[%s1462_s1 + $0x28] sm:$0xff] }
   0x3   :  { %v801_v5 = vpack.c.bf16 %v26_v4, %v25_v2  ;;  %v15_v8 = vld [vmem:[%s1461_s0] sm:$0xff]  ;;  %v29_v9 = vld [vmem:[%s1462_s1 + $0x30] sm:$0xff]  ;;  %v805_v10 = vpack.c.bf16 %v28_v7, %v27_v6  ;;  %v30_v11 = vld [vmem:[%s1462_s1 + $0x38] sm:$0xff] }
   0x4   :  { %798 = vmatprep.subr.bf16.mxu0 %v797_v3  ;;  %785 = vmatprep.mubr.msk.f32.mxu0 %vm36_vm0, %v15_v8  ;;  %v190_v12 = vld [vmem:[%s1463_s2 + $0x80] sm:$0xff]  ;;  %v191_v13 = vld [vmem:[%s1463_s2 + $0x88] sm:$0xff]  ;;  %v192_v17 = vld [vmem:[%s1463_s2 + $0x90] sm:$0xff]  ;;  %v809_v23 = vpack.c.bf16 %v30_v11, %v29_v9 }
   0x5   :  { %800 = vmatpush3.bf16.msra.mxu0 %v797_v3  ;;  %v813_v14 = vpack.c.bf16 %v191_v13, %v190_v12  ;;  %v174_v15 = vld [vmem:[%s1463_s2] sm:$0xff]  ;;  %v175_v16 = vld [vmem:[%s1463_s2 + $0x8] sm:$0xff]  ;;  %v193_v19 = vld [vmem:[%s1463_s2 + $0x98] sm:$0xff] }
   0x6   :  { %802 = vmatprep.subr.bf16.mxu0 %v801_v5  ;;  %v815_v18 = vpack.c.bf16 %v175_v16, %v174_v15  ;;  %v817_v20 = vpack.c.bf16 %v193_v19, %v192_v17  ;;  %v176_v21 = vld [vmem:[%s1463_s2 + $0x10] sm:$0xff]  ;;  %v177_v22 = vld [vmem:[%s1463_s2 + $0x18] sm:$0xff]  ;;  %v194_v25 = vld [vmem:[%s1463_s2 + $0xa0] sm:$0xff] }
   0x7   :  { %814 = vmatprep.subr.bf16.mxu1 %v813_v14  ;;  %v819_v24 = vpack.c.bf16 %v177_v22, %v176_v21  ;;  %v195_v26 = vld [vmem:[%s1463_s2 + $0xa8] sm:$0xff]  ;;  %v222_v27 = vld [vmem:[%s1463_s2 + $0x180] sm:$0xff]  ;;  %v196_v32 = vld [vmem:[%s1463_s2 + $0xb0] sm:$0xff] }
   0x8   :  { %816 = vmatpush3.bf16.msra.mxu1 %v815_v18  ;;  %v223_v28 = vld [vmem:[%s1463_s2 + $0x188] sm:$0xff]  ;;  %v821_v29 = vpack.c.bf16 %v195_v26, %v194_v25  ;;  %v178_v30 = vld [vmem:[%s1463_s2 + $0x20] sm:$0xff]  ;;  %v197_v33 = vld [vmem:[%s1463_s2 + $0xb8] sm:$0xff] }
   0x9   :  { %804 = vmatpush3.bf16.msra.mxu0 %v801_v5  ;;  %818 = vmatprep.subr.bf16.mxu1 %v817_v20  ;;  %v179_v31 = vld [vmem:[%s1463_s2 + $0x28] sm:$0xff]  ;;  %v845_v34 = vpack.c.bf16 %v223_v28, %v222_v27  ;;  %v206_v35 = vld [vmem:[%s1463_s2 + $0x100] sm:$0xff]  ;;  %v224_v37 = vld [vmem:[%s1463_s2 + $0x190] sm:$0xff]  ;;  %v825_v40 = vpack.c.bf16 %v197_v33, %v196_v32 }
   0xa   :  { %806 = vmatprep.subr.bf16.mxu0 %v805_v10  ;;  %v207_v36 = vld [vmem:[%s1463_s2 + $0x108] sm:$0xff]  ;;  %v823_v38 = vpack.c.bf16 %v179_v31, %v178_v30  ;;  %v225_v39 = vld [vmem:[%s1463_s2 + $0x198] sm:$0xff]  ;;  %v180_v41 = vld [vmem:[%s1463_s2 + $0x30] sm:$0xff] }
   0xb   :  { %v181_v42 = vld [vmem:[%s1463_s2 + $0x38] sm:$0xff]  ;;  %v198_v43 = vld [vmem:[%s1463_s2 + $0xc0] sm:$0xff]  ;;  %v199_v44 = vld [vmem:[%s1463_s2 + $0xc8] sm:$0xff]  ;;  %v847_v47 = vpack.c.bf16 %v207_v36, %v206_v35  ;;  %v849_v48 = vpack.c.bf16 %v225_v39, %v224_v37 }
   0xc   :  { %820 = vmatpush3.bf16.msra.mxu1 %v819_v24  ;;  %v16_v45 = vld [vmem:[%s1461_s0 + $0x8] sm:$0xff]  ;;  %v17_v46 = vld [vmem:[%s1461_s0 + $0x10] sm:$0xff]  ;;  %v209_v50 = vld [vmem:[%s1463_s2 + $0x118] sm:$0xff]  ;;  %v827_v52 = vpack.c.bf16 %v181_v42, %v180_v41  ;;  %v829_v54 = vpack.c.bf16 %v199_v44, %v198_v43 }
   0xd   :  { %808 = vmatpush3.bf16.msra.mxu0 %v805_v10  ;;  %822 = vmatprep.subr.bf16.mxu1 %v821_v29  ;;  %v208_v49 = vld [vmem:[%s1463_s2 + $0x110] sm:$0xff]  ;;  %v226_v51 = vld [vmem:[%s1463_s2 + $0x1a0] sm:$0xff]  ;;  %v227_v53 = vld [vmem:[%s1463_s2 + $0x1a8] sm:$0xff] }
   0xe   :  { %810 = vmatprep.subr.bf16.mxu0 %v809_v23  ;;  %v182_v55 = vld [vmem:[%s1463_s2 + $0x40] sm:$0xff]  ;;  %v183_v56 = vld [vmem:[%s1463_s2 + $0x48] sm:$0xff]  ;;  %v200_v57 = vld [vmem:[%s1463_s2 + $0xd0] sm:$0xff]  ;;  %v851_v61 = vpack.c.bf16 %v209_v50, %v208_v49  ;;  %v853_v63 = vpack.c.bf16 %v227_v53, %v226_v51 }
   0xf   :  { %v201_v58 = vld [vmem:[%s1463_s2 + $0xd8] sm:$0xff]  ;;  %v19_v60 = vld [vmem:[%s1461_s0 + $0x20] sm:$0xff]  ;;  %v211_v0 = vld [vmem:[%s1463_s2 + $0x128] sm:$0xff]  ;;  %v831_v3 = vpack.c.bf16 %v183_v56, %v182_v55 }
  0x10   :  { %824 = vmatpush3.bf16.msra.mxu1 %v823_v38  ;;  %v18_v59 = vld [vmem:[%s1461_s0 + $0x18] sm:$0xff]  ;;  %v210_v62 = vld [vmem:[%s1463_s2 + $0x120] sm:$0xff]  ;;  %v228_v1 = vld [vmem:[%s1463_s2 + $0x1b0] sm:$0xff]  ;;  %v833_v4 = vpack.c.bf16 %v201_v58, %v200_v57 }
  0x11   :  { %812 = vmatpush3.bf16.msra.mxu0 %v809_v23  ;;  %826 = vmatprep.subr.bf16.mxu1 %v825_v40  ;;  %v229_v2 = vld [vmem:[%s1463_s2 + $0x1b8] sm:$0xff]  ;;  %v184_v5 = vld [vmem:[%s1463_s2 + $0x50] sm:$0xff] }
  0x12   :  { %846 = vmatprep.subr.bf16.mxu0 %v845_v34  ;;  %v185_v6 = vld [vmem:[%s1463_s2 + $0x58] sm:$0xff] }
  0x14   :  { %786 = vmatmul.mubr.msk.f32.vlgmr.msra.gmra.mrb[0].mxu0 %vm36_vm0, %v16_v45  ;;  %828 = vmatpush3.bf16.msra.mxu1 %v827_v52 }
  0x15   :  { %788 = vmatprep.mubr.msk.f32.mxu0 %vm36_vm0, %v17_v46  ;;  %848 = vmatpush3.bf16.msra.mxu0 %v847_v47 }
  0x16   :  { %850 = vmatprep.subr.bf16.mxu0 %v849_v48  ;;  %830 = vmatprep.subr.bf16.mxu1 %v829_v54 }
  0x17   :  { %8 = vsyncpa [#allocation3], 0  ;;  %v202_v7 = vld [vmem:[%s1463_s2 + $0xe0] sm:$0xff]  ;;  %v203_v8 = vld [vmem:[%s1463_s2 + $0xe8] sm:$0xff]  ;;  %v855_v11 = vpack.c.bf16 %v211_v0, %v210_v62  ;;  %v857_v12 = vpack.c.bf16 %v229_v2, %v228_v1  ;;  %v835_v16 = vpack.c.bf16 %v185_v6, %v184_v5  ;;  %s966_s24 = smov [#allocation2]   ;;  %vm587_vm1 = vcmask 17408  }
  0x18   :  { %789 = vmatmul.mubr.msk.f32.gmra.mrb[2].mxu0 %vm36_vm0, %v18_v59  ;;  %v20_v9 = vld [vmem:[%s1461_s0 + $0x28] sm:$0xff]  ;;  %v21_v10 = vld [vmem:[%s1461_s0 + $0x30] sm:$0xff]  ;;  %832 = vmatpush3.bf16.msra.mxu1 %v831_v3  ;;  %v213_v14 = vld [vmem:[%s1463_s2 + $0x138] sm:$0xff]  ;;  %v837_v18 = vpack.c.bf16 %v203_v8, %v202_v7  ;;  %s595_s25 = sshll.u32 %s966_s24, 4  ;;  %s596_s25 = int_to_ptr.vmem [resolvable:$true] %s595_s25 }
  0x19   :  { %791 = vmatprep.mubr.msk.f32.mxu0 %vm36_vm0, %v19_v60  ;;  %852 = vmatpush3.bf16.msra.mxu0 %v851_v61  ;;  %v212_v13 = vld [vmem:[%s1463_s2 + $0x130] sm:$0xff]  ;;  %v230_v15 = vld [vmem:[%s1463_s2 + $0x1c0] sm:$0xff]  ;;  %v231_v17 = vld [vmem:[%s1463_s2 + $0x1c8] sm:$0xff]  ;;  %p947_p1 = scmp.lt.s32.totalorder %s596_s25, %s596_s25 }
  0x1a   :  { %854 = vmatprep.subr.bf16.mxu0 %v853_v63  ;;  %834 = vmatprep.subr.bf16.mxu1 %v833_v4  ;;  %v186_v19 = vld [vmem:[%s1463_s2 + $0x60] sm:$0xff]  ;;  %v187_v20 = vld [vmem:[%s1463_s2 + $0x68] sm:$0xff]  ;;  %v22_v21 = vld [vmem:[%s1461_s0 + $0x38] sm:$0xff]  ;;  %v859_v22 = vpack.c.bf16 %v213_v14, %v212_v13  ;;  %v861_v23 = vpack.c.bf16 %v231_v17, %v230_v15 }
  0x1b   :  { %v214_v24 = vld [vmem:[%s1463_s2 + $0x140] sm:$0xff]  ;;  %v215_v25 = vld [vmem:[%s1463_s2 + $0x148] sm:$0xff]  ;;  %v839_v26 = vpack.c.bf16 %v187_v20, %v186_v19  ;;  %v232_v27 = vld [vmem:[%s1463_s2 + $0x1d0] sm:$0xff] }
  0x1c   :  { %792 = vmatmul.mubr.msk.f32.gmra.mrb[4].mxu0 %vm36_vm0, %v20_v9  ;;  %836 = vmatpush3.bf16.msra.mxu1 %v835_v16  ;;  %v233_v28 = vld [vmem:[%s1463_s2 + $0x1d8] sm:$0xff]  ;;  %v863_v29 = vpack.c.bf16 %v215_v25, %v214_v24  ;;  %v216_v31 = vld [vmem:[%s1463_s2 + $0x150] sm:$0xff]  ;;  %v234_v36 = vld [vmem:[%s1463_s2 + $0x1e0] sm:$0xff] }
  0x1d   :  { %794 = vmatprep.mubr.msk.f32.mxu0 %vm36_vm0, %v21_v10  ;;  %856 = vmatpush3.bf16.msra.mxu0 %v855_v11  ;;  %v865_v30 = vpack.c.bf16 %v233_v28, %v232_v27  ;;  %v217_v32 = vld [vmem:[%s1463_s2 + $0x158] sm:$0xff]  ;;  %v204_v34 = vld [vmem:[%s1463_s2 + $0xf0] sm:$0xff]  ;;  %v235_v38 = vld [vmem:[%s1463_s2 + $0x1e8] sm:$0xff] }
  0x1e   :  { %858 = vmatprep.subr.bf16.mxu0 %v857_v12  ;;  %838 = vmatprep.subr.bf16.mxu1 %v837_v18  ;;  %v867_v33 = vpack.c.bf16 %v217_v32, %v216_v31  ;;  %v205_v35 = vld [vmem:[%s1463_s2 + $0xf8] sm:$0xff]  ;;  %v188_v39 = vld [vmem:[%s1463_s2 + $0x70] sm:$0xff]  ;;  %v869_v41 = vpack.c.bf16 %v235_v38, %v234_v36  ;;  %v218_v43 = vld [vmem:[%s1463_s2 + $0x160] sm:$0xff] }
  0x1f   :  { %v841_v37 = vpack.c.bf16 %v205_v35, %v204_v34  ;;  %v189_v40 = vld [vmem:[%s1463_s2 + $0x78] sm:$0xff]  ;;  %v219_v44 = vld [vmem:[%s1463_s2 + $0x168] sm:$0xff]  ;;  %v236_v46 = vld [vmem:[%s1463_s2 + $0x1f0] sm:$0xff] }
  0x20   :  { %795 = vmatmul.mubr.msk.f32.gmra.mrb[6].mxu0 %vm36_vm0, %v22_v21  ;;  %840 = vmatpush3.bf16.msra.mxu1 %v839_v26  ;;  %v843_v42 = vpack.c.bf16 %v189_v40, %v188_v39  ;;  %v871_v45 = vpack.c.bf16 %v219_v44, %v218_v43  ;;  %v237_v47 = vld [vmem:[%s1463_s2 + $0x1f8] sm:$0xff]  ;;  %v254_v48 = vld [vmem:[%s1463_s2 + $0x280] sm:$0xff]  ;;  %v255_v50 = vld [vmem:[%s1463_s2 + $0x288] sm:$0xff] }
  0x21   :  { %860 = vmatpush3.bf16.msra.mxu0 %v859_v22  ;;  %842 = vmatprep.subr.bf16.mxu1 %v841_v37  ;;  %v873_v49 = vpack.c.bf16 %v237_v47, %v236_v46  ;;  %v220_v51 = vld [vmem:[%s1463_s2 + $0x170] sm:$0xff]  ;;  %v221_v52 = vld [vmem:[%s1463_s2 + $0x178] sm:$0xff]  ;;  %v877_v53 = vpack.c.bf16 %v255_v50, %v254_v48  ;;  %v286_v55 = vld [vmem:[%s1463_s2 + $0x380] sm:$0xff] }
  0x22   :  { %862 = vmatprep.subr.bf16.mxu0 %v861_v23  ;;  %v875_v54 = vpack.c.bf16 %v221_v52, %v220_v51  ;;  %v287_v56 = vld [vmem:[%s1463_s2 + $0x388] sm:$0xff]  ;;  %v1250_v58 = vld [vmem:[%s1462_s1 + $0x40] ss:$0 sm:$0xff]  ;;  %v256_v0 = vld [vmem:[%s1463_s2 + $0x290] sm:$0xff]  ;;  %s942_s1 = scalar_lea.vmem %s596_s25, 32 }
  0x23   :  { %v909_v57 = vpack.c.bf16 %v287_v56, %v286_v55  ;;  %v238_v60 = vld [vmem:[%s1463_s2 + $0x200] sm:$0xff]  ;;  %v239_v61 = vld [vmem:[%s1463_s2 + $0x208] sm:$0xff]  ;;  %v257_v1 = vld [vmem:[%s1463_s2 + $0x298] sm:$0xff]  ;;  %p943_p0 = scmp.ne.s32.totalorder %s596_s25, %s942_s1  ;;  %p948_p2 = scmp.lt.s32.totalorder %s942_s1, %s942_s1 }
  0x24   :  { %844 = vmatpush3.bf16.msra.mxu1 %v843_v42  ;;  %v879_v4 = vpack.c.bf16 %v239_v61, %v238_v60  ;;  %v240_v5 = vld [vmem:[%s1463_s2 + $0x210] sm:$0xff]  ;;  %v241_v6 = vld [vmem:[%s1463_s2 + $0x218] sm:$0xff]  ;;  %v881_v9 = vpack.c.bf16 %v257_v1, %v256_v0  ;;  %v270_v10 = vld [vmem:[%s1463_s2 + $0x300] sm:$0xff] }
  0x25   :  { %864 = vmatpush3.bf16.msra.mxu0 %v863_v29  ;;  %878 = vmatprep.subr.bf16.mxu1 %v877_v53  ;;  %v271_v11 = vld [vmem:[%s1463_s2 + $0x308] sm:$0xff]  ;;  %v258_v12 = vld [vmem:[%s1463_s2 + $0x2a0] sm:$0xff]  ;;  %v288_v16 = vld [vmem:[%s1463_s2 + $0x390] sm:$0xff]  ;;  %v883_v20 = vpack.c.bf16 %v241_v6, %v240_v5  ;;  %p949_p3 = por %p948_p2, %p947_p1 }
  0x26   :  { %866 = vmatprep.subr.bf16.mxu0 %v865_v30  ;;  %v259_v15 = vld [vmem:[%s1463_s2 + $0x2a8] sm:$0xff]  ;;  %v289_v17 = vld [vmem:[%s1463_s2 + $0x398] sm:$0xff]  ;;  %v911_v21 = vpack.c.bf16 %v271_v11, %v270_v10  ;;  %v242_v22 = vld [vmem:[%s1463_s2 + $0x220] sm:$0xff] }
  0x27   :  { %v243_v23 = vld [vmem:[%s1463_s2 + $0x228] sm:$0xff]  ;;  %v885_v25 = vpack.c.bf16 %v259_v15, %v258_v12  ;;  %v913_v26 = vpack.c.bf16 %v289_v17, %v288_v16  ;;  %v272_v27 = vld [vmem:[%s1463_s2 + $0x310] sm:$0xff]  ;;  %v273_v28 = vld [vmem:[%s1463_s2 + $0x318] sm:$0xff]  ;;  %p950_p4 = pnand %p949_p3, %p943_p0 }
  0x28   :  { %v260_v29 = vld [vmem:[%s1463_s2 + $0x2b0] sm:$0xff]  ;;  %v261_v31 = vld [vmem:[%s1463_s2 + $0x2b8] sm:$0xff]  ;;  %v290_v32 = vld [vmem:[%s1463_s2 + $0x3a0] sm:$0xff]  ;;  %v887_v36 = vpack.c.bf16 %v243_v23, %v242_v22  ;;  %v915_v37 = vpack.c.bf16 %v273_v28, %v272_v27 }
  0x29   :  { %868 = vmatpush3.bf16.msra.mxu0 %v867_v33  ;;  %v291_v33 = vld [vmem:[%s1463_s2 + $0x3a8] sm:$0xff]  ;;  %v244_v38 = vld [vmem:[%s1463_s2 + $0x230] sm:$0xff]  ;;  %v245_v39 = vld [vmem:[%s1463_s2 + $0x238] sm:$0xff] }
  0x2a   :  { %870 = vmatprep.subr.bf16.mxu0 %v869_v41  ;;  %v889_v41 = vpack.c.bf16 %v261_v31, %v260_v29  ;;  %v917_v42 = vpack.c.bf16 %v291_v33, %v290_v32  ;;  %v274_v43 = vld [vmem:[%s1463_s2 + $0x320] sm:$0xff]  ;;  %v275_v44 = vld [vmem:[%s1463_s2 + $0x328] sm:$0xff]  ;;  %v292_v48 = vld [vmem:[%s1463_s2 + $0x3b0] sm:$0xff]  ;;  %v891_v52 = vpack.c.bf16 %v245_v39, %v244_v38 }
  0x2b   :  { %v263_v47 = vld [vmem:[%s1463_s2 + $0x2c8] sm:$0xff]  ;;  %v919_v53 = vpack.c.bf16 %v275_v44, %v274_v43  ;;  %v276_v60 = vld [vmem:[%s1463_s2 + $0x330] sm:$0xff]  ;;  %v277_v61 = vld [vmem:[%s1463_s2 + $0x338] sm:$0xff] }
  0x2c   :  { %v247_v55 = vld [vmem:[%s1463_s2 + $0x248] sm:$0xff]  ;;  %v294_v0 = vld [vmem:[%s1463_s2 + $0x3c0] sm:$0xff]  ;;  %v249_v5 = vld [vmem:[%s1463_s2 + $0x258] sm:$0xff] }
  0x2d   :  { %872 = vmatpush3.bf16.msra.mxu0 %v871_v45  ;;  %v262_v45 = vld [vmem:[%s1463_s2 + $0x2c0] sm:$0xff]  ;;  %v295_v1 = vld [vmem:[%s1463_s2 + $0x3c8] sm:$0xff]  ;;  %v296_v12 = vld [vmem:[%s1463_s2 + $0x3d0] sm:$0xff] }
  0x2e   :  { %874 = vmatprep.subr.bf16.mxu0 %v873_v49  ;;  %v293_v49 = vld [vmem:[%s1463_s2 + $0x3b8] sm:$0xff]  ;;  %v266_v10 = vld [vmem:[%s1463_s2 + $0x2e0] sm:$0xff]  ;;  %v267_v11 = vld [vmem:[%s1463_s2 + $0x2e8] sm:$0xff] }
  0x2f   :  { %v250_v16 = vld [vmem:[%s1463_s2 + $0x260] sm:$0xff]  ;;  %v251_v17 = vld [vmem:[%s1463_s2 + $0x268] sm:$0xff]  ;;  %v268_v22 = vld [vmem:[%s1463_s2 + $0x2f0] sm:$0xff] }
  0x30   :  { %v269_v23 = vld [vmem:[%s1463_s2 + $0x2f8] sm:$0xff]  ;;  %v252_v28 = vld [vmem:[%s1463_s2 + $0x270] sm:$0xff]  ;;  %v282_v32 = vld [vmem:[%s1463_s2 + $0x360] sm:$0xff] }
  0x31   :  { %876 = vmatpush3.bf16.msra.mxu0 %v875_v54  ;;  %v246_v54 = vld [vmem:[%s1463_s2 + $0x240] sm:$0xff]  ;;  %v905_v29 = vpack.c.bf16 %v269_v23, %v268_v22  ;;  %v253_v31 = vld [vmem:[%s1463_s2 + $0x278] sm:$0xff]  ;;  %v283_v33 = vld [vmem:[%s1463_s2 + $0x368] sm:$0xff] }
  0x32   :  { %910 = vmatprep.subr.bf16.mxu0 %v909_v57  ;;  %v893_v57 = vpack.c.bf16 %v263_v47, %v262_v45  ;;  %v907_v38 = vpack.c.bf16 %v253_v31, %v252_v28  ;;  %v935_v39 = vpack.c.bf16 %v283_v33, %v282_v32 }
  0xe7   :  { %v787_v59 = vpop.f32.mrb[0].mxu0 }
  0xe8   :  { %v127_v62 = vpop.f32.mrb[1].mxu0  ;;  %v133_v63 = vadd.f32 %v787_v59, %v1250_v58  ;;  %v921_v59 = vpack.c.bf16 %v293_v49, %v292_v48  ;;  %v612_v49 = vld [vmem:[%s1463_s2 + $0x400] ss:$0 sm:$0xff] }
  0xe9   :  { %v128_v2 = vadd.f32 %v1250_v58, %v127_v62  ;;  %v264_v62 = vld [vmem:[%s1463_s2 + $0x2d0] sm:$0xff] }
  0xea   :  { %v167_v3 = vmax.f32 %v133_v63, 0.0  ;;  %v265_v63 = vld [vmem:[%s1463_s2 + $0x2d8] sm:$0xff] }
  0xeb   :  { %v166_v7 = vmax.f32 %v128_v2, 0.0  ;;  %v790_v8 = vpop.f32.mrb[2].mxu0  ;;  %v895_v2 = vpack.c.bf16 %v247_v55, %v246_v54  ;;  %v897_v6 = vpack.c.bf16 %v265_v63, %v264_v62 }
  0xec   :  { %v143_v13 = vadd.f32 %v790_v8, %v1250_v58  ;;  %v137_v14 = vpop.f32.mrb[3].mxu0  ;;  %371 = vmatprep.mubr.f32.mxu1 %v167_v3  ;;  %v923_v3 = vpack.c.bf16 %v277_v61, %v276_v60  ;;  %v278_v8 = vld [vmem:[%s1463_s2 + $0x340] sm:$0xff] }
  0xed   :  { %v138_v18 = vadd.f32 %v1250_v58, %v137_v14  ;;  %372 = vmatmul.mubr.f32.vlgmr.msra.gmra.mrb[0].mxu1 %v166_v7  ;;  %v925_v7 = vpack.c.bf16 %v295_v1, %v294_v0 }
  0xee   :  { %v169_v19 = vmax.f32 %v143_v13, 0.0  ;;  %880 = vmatpush3.bf16.msra.mxu1 %v879_v4  ;;  %v248_v4 = vld [vmem:[%s1463_s2 + $0x250] sm:$0xff]  ;;  %v297_v13 = vld [vmem:[%s1463_s2 + $0x3d8] sm:$0xff] }
  0xef   :  { %v168_v24 = vmax.f32 %v138_v18, 0.0  ;;  %882 = vmatprep.subr.bf16.mxu1 %v881_v9  ;;  %v793_v30 = vpop.f32.mrb[4].mxu0  ;;  %v279_v9 = vld [vmem:[%s1463_s2 + $0x348] sm:$0xff]  ;;  %v899_v14 = vpack.c.bf16 %v249_v5, %v248_v4  ;;  %v901_v18 = vpack.c.bf16 %v267_v11, %v266_v10 }
  0xf0   :  { %441 = vmatprep.mubr.f32.mxu0 %v169_v19  ;;  %v153_v34 = vadd.f32 %v793_v30, %v1250_v58  ;;  %v1317_v35 = vpop.f32.mrb[5].mxu0  ;;  %v927_v15 = vpack.c.bf16 %v279_v9, %v278_v8  ;;  %v929_v19 = vpack.c.bf16 %v297_v13, %v296_v12 }
  0xf1   :  { %442 = vmatmul.mubr.f32.vlgmr.msra.gmra.mrb[8].mxu0 %v168_v24  ;;  %v298_v24 = vld [vmem:[%s1463_s2 + $0x3e0] sm:$0xff] }
  0xf2   :  { %884 = vmatpush3.bf16.msra.mxu1 %v883_v20  ;;  %912 = vmatpush3.bf16.msra.mxu0 %v911_v21  ;;  %v171_v40 = vmax.f32 %v153_v34, 0.0  ;;  %v280_v20 = vld [vmem:[%s1463_s2 + $0x350] sm:$0xff]  ;;  %v281_v21 = vld [vmem:[%s1463_s2 + $0x358] sm:$0xff] }
  0xf3   :  { %886 = vmatprep.subr.bf16.mxu1 %v885_v25  ;;  %914 = vmatprep.subr.bf16.mxu0 %v913_v26  ;;  %v796_v46 = vpop.f32.mrb[6].mxu0  ;;  %v299_v25 = vld [vmem:[%s1463_s2 + $0x3e8] sm:$0xff]  ;;  %v903_v26 = vpack.c.bf16 %v251_v17, %v250_v16  ;;  %v931_v27 = vpack.c.bf16 %v281_v21, %v280_v20  ;;  %v300_v34 = vld [vmem:[%s1463_s2 + $0x3f0] sm:$0xff] }
  0xf4   :  { %v163_v50 = vadd.f32 %v796_v46, %v1250_v58  ;;  %v1344_v51 = vpop.f32.mrb[7].mxu0  ;;  %511 = vmatprep.mubr.f32.mxu1 %v171_v40  ;;  %v933_v30 = vpack.c.bf16 %v299_v25, %v298_v24 }
  0xf5   :  { %v158_v44 = vadd.f32 %v1250_v58, %v1344_v51 }
  0xf6   :  { %888 = vmatpush3.bf16.msra.mxu1 %v887_v36  ;;  %916 = vmatpush3.bf16.msra.mxu0 %v915_v37  ;;  %v173_v56 = vmax.f32 %v163_v50, 0.0  ;;  %v301_v36 = vld [vmem:[%s1463_s2 + $0x3f8] sm:$0xff]  ;;  %v148_v37 = vadd.f32 %v1250_v58, %v1317_v35 }
  0xf7   :  { %890 = vmatprep.subr.bf16.mxu1 %v889_v41  ;;  %918 = vmatprep.subr.bf16.mxu0 %v917_v42  ;;  %v937_v40 = vpack.c.bf16 %v301_v36, %v300_v34  ;;  %v284_v41 = vld [vmem:[%s1463_s2 + $0x370] sm:$0xff]  ;;  %v285_v42 = vld [vmem:[%s1463_s2 + $0x378] sm:$0xff]  ;;  %v172_v45 = vmax.f32 %v158_v44, 0.0 }
  0xf8   :  { %581 = vmatprep.mubr.f32.mxu0 %v173_v56  ;;  %v170_v43 = vmax.f32 %v148_v37, 0.0  ;;  %v939_v35 = vpack.c.bf16 %v285_v42, %v284_v41 }
  0xfa   :  { %892 = vmatpush3.bf16.msra.mxu1 %v891_v52  ;;  %920 = vmatpush3.bf16.msra.mxu0 %v919_v53 }
  0xfb   :  { %894 = vmatprep.subr.bf16.mxu1 %v893_v57  ;;  %922 = vmatprep.subr.bf16.mxu0 %v921_v59 }
  0xfe   :  { %896 = vmatpush3.bf16.msra.mxu1 %v895_v2  ;;  %924 = vmatpush3.bf16.msra.mxu0 %v923_v3 }
  0xff   :  { %898 = vmatprep.subr.bf16.mxu1 %v897_v6  ;;  %926 = vmatprep.subr.bf16.mxu0 %v925_v7 }
 0x102   :  { %900 = vmatpush3.bf16.msra.mxu1 %v899_v14  ;;  %928 = vmatpush3.bf16.msra.mxu0 %v927_v15 }
 0x103   :  { %902 = vmatprep.subr.bf16.mxu1 %v901_v18  ;;  %930 = vmatprep.subr.bf16.mxu0 %v929_v19 }
 0x106   :  { %904 = vmatpush3.bf16.msra.mxu1 %v903_v26  ;;  %932 = vmatpush3.bf16.msra.mxu0 %v931_v27 }
 0x107   :  { %906 = vmatprep.subr.bf16.mxu1 %v905_v29  ;;  %934 = vmatprep.subr.bf16.mxu0 %v933_v30 }
 0x10a   :  { %908 = vmatpush3.bf16.msra.mxu1 %v907_v38  ;;  %936 = vmatpush3.bf16.msra.mxu0 %v935_v39 }
 0x10b   :  { %938 = vmatprep.subr.bf16.mxu0 %v937_v40 }
 0x10d   :  { %512 = vmatmul.mubr.f32.vlgmr.msra.gmra.mrb[2].mxu1 %v170_v43 }
 0x10e   :  { %940 = vmatpush3.bf16.msra.mxu0 %v939_v35 }
 0x111   :  { %582 = vmatmul.mubr.f32.vlgmr.msra.gmra.mrb[10].mxu0 %v172_v45 }
 0x1c0   :  { %v661_v46 = vpop.f32.mrb[0].mxu1 }
 0x1c1   :  { %v662_v47 = vpop.f32.mrb[1].mxu1 }
 0x1c2   :  { %v663_v48 = vadd.f32 %v662_v47, %v661_v46 }
 0x1c4   :  { %v696_v50 = vpop.f32.mrb[8].mxu0  ;;  %v374_v53 = vadd.f32 %v663_v48, %v612_v49 }
 0x1c5   :  { %v697_v52 = vpop.f32.mrb[9].mxu0 }
 0x1c6   :  { %v698_v54 = vadd.f32 %v697_v52, %v696_v50 }
 0x1c8   :  { %v444_v58 = vadd.f32 %v698_v54, %v374_v53 }
 0x1e0   :  { %v731_v51 = vpop.f32.mrb[2].mxu1 }
 0x1e1   :  { %v732_v55 = vpop.f32.mrb[3].mxu1 }
 0x1e2   :  { %v733_v56 = vadd.f32 %v732_v55, %v731_v51 }
 0x1e4   :  { %v514_v57 = vadd.f32 %v733_v56, %v444_v58  ;;  %v766_v59 = vpop.f32.mrb[10].mxu0 }
 0x1e5   :  { %v767_v60 = vpop.f32.mrb[11].mxu0 }
 0x1e6   :  { %v768_v61 = vadd.f32 %v767_v60, %v766_v59 }
 0x1e8   :  { %v584_v62 = vadd.f32 %v768_v61, %v514_v57 }
 0x1ea   :  { %588 = vst.msk [vmem:[#allocation2] sm:$0x3] %vm587_vm1, %v584_v62 }
 0x1eb   :  { %953 = shalt.err (!%p950_p4)
}
 0x1ec   :  { %s954_s27 = scalar_lea.hbm %s1464_s3, 32 }
 0x1ed   :  { %p955_p5 = scmp.ne.s32.totalorder %s1464_s3, %s954_s27  ;;  %p958_p6 = scmp.lt.u32.totalorder %s954_s27, %s1464_s3 }
 0x1ef   :  { %p960_p7 = pnand %p958_p6, %p955_p5 }
 0x1f1   :  { %963 = shalt.err (!%p960_p7)
}
 0x1f2   :  { %598 = dma.vmem_to_hbm [thread:$0]  %s596_s25, 32, %s1464_s3, [#allocation3]  }
 0x1f3   :  { %964 = dma.done.wait [#allocation3], 32  }
 0x1f4   :  { %965 = vsyncadd [#allocation3], 4294967264 }
 0x1f5   :  { %602 = vsyncpa [#allocation3], 1 }

</bundles_post_ra>
